<compile_context>
chip_gen: v7x
topology: tpu7x:2x2x1
jax: 0.10.0
libtpu: 0.0.40
codegen_flags: <defaults>
</compile_context>

<pallas_src>
import jax
import jax.numpy as jnp
from jax.experimental import pallas as pl
from jax.experimental.pallas import tpu as pltpu


def policy_kernel(x_ref, w_in_ref, b_in_ref, w_fc_ref, b_fc_ref,
                  w_mean_ref, b_mean_ref, mean_ref):
    # --- layer 1: input linear + tanh (MXU matmul, EUP tanh) ---
    h = jnp.dot(x_ref[...], w_in_ref[...], preferred_element_type=jnp.float32)
    h = jnp.tanh(h + b_in_ref[...])
    # --- layer 2: hidden linear + tanh ---
    h = jnp.dot(h, w_fc_ref[...], preferred_element_type=jnp.float32)
    h = jnp.tanh(h + b_fc_ref[...])
    # --- mean head (lane-padded to a multiple of 128 columns) ---
    m = jnp.dot(h, w_mean_ref[...], preferred_element_type=jnp.float32)
    mean_ref[...] = (m + b_mean_ref[...]).astype(mean_ref.dtype)


def policy_forward(x, params, tile_b=256):
    """Fused PolicyNetwork forward. Returns (mean, std)."""
    w_in, b_in, w_fc, b_fc, w_mean, b_mean, log_std = params
    B, num_input = x.shape
    num_hidden = w_in.shape[1]
    num_output = w_mean.shape[1]

    # ---- lane-dense mean head: pad output columns to a multiple of 128 ----
    n_pad = max(128, ((num_output + 127) // 128) * 128)
    if n_pad != num_output:
        w_mean_p = jnp.zeros((num_hidden, n_pad), w_mean.dtype)
        w_mean_p = w_mean_p.at[:, :num_output].set(w_mean)
        b_mean_p = jnp.zeros((1, n_pad), b_mean.dtype)
        b_mean_p = b_mean_p.at[:, :num_output].set(b_mean)
    else:
        w_mean_p, b_mean_p = w_mean, b_mean

    # ---- batch tiling: TILE_B rows per grid step (multiple of 8 sublanes) ----
    tile_b = max(8, min(int(tile_b), ((B + 7) // 8) * 8))
    tile_b = ((tile_b + 7) // 8) * 8
    n_blocks = pl.cdiv(B, tile_b)
    b_pad = n_blocks * tile_b
    x_p = x if b_pad == B else jnp.pad(x, ((0, b_pad - B), (0, 0)))

    vmem = pltpu.MemorySpace.VMEM
    # Weights/biases: full-array blocks, constant index map -> DMA'd once,
    # VMEM-resident across all batch tiles.
    resident = lambda a: pl.BlockSpec(a.shape, lambda i: (0,) * a.ndim,
                                      memory_space=vmem)

    flops = 2 * b_pad * (num_input * num_hidden
                         + num_hidden * num_hidden
                         + num_hidden * n_pad)
    bytes_accessed = 4 * (b_pad * num_input
                          + num_input * num_hidden + num_hidden
                          + num_hidden * num_hidden + num_hidden
                          + num_hidden * n_pad + n_pad
                          + b_pad * n_pad)
    cost = pl.CostEstimate(flops=flops,
                           transcendentals=2 * b_pad * num_hidden,
                           bytes_accessed=bytes_accessed)

    mean_padded = pl.pallas_call(
        policy_kernel,
        out_shape=jax.ShapeDtypeStruct((b_pad, n_pad), jnp.float32),
        grid=(n_blocks,),
        in_specs=[
            pl.BlockSpec((tile_b, num_input), lambda i: (i, 0),
                         memory_space=vmem),
            resident(w_in), resident(b_in),
            resident(w_fc), resident(b_fc),
            resident(w_mean_p), resident(b_mean_p),
        ],
        out_specs=pl.BlockSpec((tile_b, n_pad), lambda i: (i, 0),
                               memory_space=vmem),
        compiler_params=pltpu.CompilerParams(
            dimension_semantics=("parallel",)),
        cost_estimate=cost,
    )(x_p, w_in, b_in, w_fc, b_fc, w_mean_p, b_mean_p)

    mean = mean_padded[:B, :num_output]
    # std = exp(log_std) is batch-independent: computed once outside the kernel.
    std = jnp.exp(log_std)
    return mean, std


def init_params(key, num_input, num_hidden, num_output):
    """Deterministic synthetic parameters (PyTorch-Linear-like uniform init)."""
    ks = jax.random.split(key, 6)

    def linear(kw, kb, fan_in, fan_out):
        bound = 1.0 / jnp.sqrt(float(fan_in))
        # stored as (in, out): transpose of PyTorch's (out, in) weight
        w = jax.random.uniform(kw, (fan_in, fan_out), jnp.float32, -bound, bound)
        b = jax.random.uniform(kb, (1, fan_out), jnp.float32, -bound, bound)
        return w, b

    w_in, b_in = linear(ks[0], ks[1], num_input, num_hidden)
    w_fc, b_fc = linear(ks[2], ks[3], num_hidden, num_hidden)
    w_mean, b_mean = linear(ks[4], ks[5], num_hidden, num_output)
    log_std = jnp.zeros((1, num_output), jnp.float32)  # nn.Parameter(zeros)
    return (w_in, b_in, w_fc, b_fc, w_mean, b_mean, log_std)


def reference_forward(x, params):
    w_in, b_in, w_fc, b_fc, w_mean, b_mean, log_std = params
    h = jnp.tanh(x @ w_in + b_in)
    h = jnp.tanh(h @ w_fc + b_fc)
    mean = h @ w_mean + b_mean
    std = jnp.exp(log_std)
    return mean, std


if __name__ == "__main__":
    num_input, num_hidden, num_output, batch = 16, 32, 8, 8
    key = jax.random.PRNGKey(0)
    k_x, k_p = jax.random.split(key)

    x = jax.random.normal(k_x, (batch, num_input), jnp.float32)
    params = init_params(k_p, num_input, num_hidden, num_output)

    mean, std = jax.block_until_ready(policy_forward(x, params))

    ref_mean, ref_std = reference_forward(x, params)
    assert mean.shape == (batch, num_output)
    assert std.shape == (1, num_output)
    assert jnp.allclose(mean, ref_mean, atol=1e-5, rtol=1e-5)
    assert jnp.allclose(std, ref_std, atol=1e-6, rtol=1e-6)

    # Also exercise a larger, non-multiple-of-tile batch to hit the grid path.
    x_big = jax.random.normal(k_x, (1000, num_input), jnp.float32)
    mean_big, _ = jax.block_until_ready(policy_forward(x_big, params, tile_b=256))
    ref_big, _ = reference_forward(x_big, params)
    assert mean_big.shape == (1000, num_output)
    assert jnp.allclose(mean_big, ref_big, atol=1e-4, rtol=1e-4)

    print("KERNEL_OK")
</pallas_src>

<mosaic_0001>
module attributes {stable_mosaic.version = 11 : i64} {
  func.func @policy_kernel(%arg0: i32, %arg1: memref<8x16xf32, #tpu.memory_space<vmem>>, %arg2: memref<16x32xf32, #tpu.memory_space<vmem>>, %arg3: memref<1x32xf32, #tpu.memory_space<vmem>>, %arg4: memref<32x32xf32, #tpu.memory_space<vmem>>, %arg5: memref<1x32xf32, #tpu.memory_space<vmem>>, %arg6: memref<32x128xf32, #tpu.memory_space<vmem>>, %arg7: memref<1x128xf32, #tpu.memory_space<vmem>>, %arg8: memref<8x128xf32, #tpu.memory_space<vmem>>) attributes {dimension_semantics = [#tpu.dimension_semantics<parallel>], iteration_bounds = array<i64: 1>, scalar_prefetch = 0 : i64, scratch_operands = 0 : i64, tpu.core_type = #tpu.core_type<tc>, window_params = [{transform_indices = @transform_0, window_bounds = array<i64: 8, 16>}, {pipeline_mode = #tpu.pipeline_mode<synchronous>, transform_indices = @transform_1, window_bounds = array<i64: 16, 32>}, {pipeline_mode = #tpu.pipeline_mode<synchronous>, transform_indices = @transform_2, window_bounds = array<i64: 1, 32>}, {pipeline_mode = #tpu.pipeline_mode<synchronous>, transform_indices = @transform_3, window_bounds = array<i64: 32, 32>}, {pipeline_mode = #tpu.pipeline_mode<synchronous>, transform_indices = @transform_4, window_bounds = array<i64: 1, 32>}, {pipeline_mode = #tpu.pipeline_mode<synchronous>, transform_indices = @transform_5, window_bounds = array<i64: 32, 128>}, {pipeline_mode = #tpu.pipeline_mode<synchronous>, transform_indices = @transform_6, window_bounds = array<i64: 1, 128>}, {transform_indices = @transform_7, window_bounds = array<i64: 8, 128>}]} {
    %c0 = arith.constant 0 : index
    %c0_0 = arith.constant 0 : index
    %0 = vector.load %arg1[%c0, %c0_0] : memref<8x16xf32, #tpu.memory_space<vmem>>, vector<8x16xf32>
    %c0_1 = arith.constant 0 : index
    %c0_2 = arith.constant 0 : index
    %1 = vector.load %arg2[%c0_1, %c0_2] : memref<16x32xf32, #tpu.memory_space<vmem>>, vector<16x32xf32>
    %cst = arith.constant dense<0.000000e+00> : vector<8x32xf32>
    %2 = tpu.matmul %0, %1, %cst {dimension_numbers = #tpu.dot_dimension_numbers<[1], [0], [0], [1], [0, 0, 1, 1], [], []>} : vector<8x16xf32>, vector<16x32xf32>, vector<8x32xf32> -> vector<8x32xf32>
    %c0_3 = arith.constant 0 : index
    %c0_4 = arith.constant 0 : index
    %3 = vector.load %arg3[%c0_3, %c0_4] : memref<1x32xf32, #tpu.memory_space<vmem>>, vector<1x32xf32>
    %4 = vector.broadcast %3 : vector<1x32xf32> to vector<8x32xf32>
    %5 = arith.addf %2, %4 : vector<8x32xf32>
    %6 = math.tanh %5 : vector<8x32xf32>
    %c0_5 = arith.constant 0 : index
    %c0_6 = arith.constant 0 : index
    %7 = vector.load %arg4[%c0_5, %c0_6] : memref<32x32xf32, #tpu.memory_space<vmem>>, vector<32x32xf32>
    %cst_7 = arith.constant dense<0.000000e+00> : vector<8x32xf32>
    %8 = tpu.matmul %6, %7, %cst_7 {dimension_numbers = #tpu.dot_dimension_numbers<[1], [0], [0], [1], [0, 0, 1, 1], [], []>} : vector<8x32xf32>, vector<32x32xf32>, vector<8x32xf32> -> vector<8x32xf32>
    %c0_8 = arith.constant 0 : index
    %c0_9 = arith.constant 0 : index
    %9 = vector.load %arg5[%c0_8, %c0_9] : memref<1x32xf32, #tpu.memory_space<vmem>>, vector<1x32xf32>
    %10 = vector.broadcast %9 : vector<1x32xf32> to vector<8x32xf32>
    %11 = arith.addf %8, %10 : vector<8x32xf32>
    %12 = math.tanh %11 : vector<8x32xf32>
    %c0_10 = arith.constant 0 : index
    %c0_11 = arith.constant 0 : index
    %13 = vector.load %arg6[%c0_10, %c0_11] : memref<32x128xf32, #tpu.memory_space<vmem>>, vector<32x128xf32>
    %cst_12 = arith.constant dense<0.000000e+00> : vector<8x128xf32>
    %14 = tpu.matmul %12, %13, %cst_12 {dimension_numbers = #tpu.dot_dimension_numbers<[1], [0], [0], [1], [0, 0, 1, 1], [], []>} : vector<8x32xf32>, vector<32x128xf32>, vector<8x128xf32> -> vector<8x128xf32>
    %c0_13 = arith.constant 0 : index
    %c0_14 = arith.constant 0 : index
    %15 = vector.load %arg7[%c0_13, %c0_14] : memref<1x128xf32, #tpu.memory_space<vmem>>, vector<1x128xf32>
    %16 = vector.broadcast %15 : vector<1x128xf32> to vector<8x128xf32>
    %17 = arith.addf %14, %16 : vector<8x128xf32>
    %c0_15 = arith.constant 0 : index
    %c0_16 = arith.constant 0 : index
    %18 = vector.load %arg8[%c0_15, %c0_16] : memref<8x128xf32, #tpu.memory_space<vmem>>, vector<8x128xf32>
    tpu.vector_store %arg8[%c0_15, %c0_16], %17 {strides = array<i32>} : memref<8x128xf32, #tpu.memory_space<vmem>>, vector<8x128xf32>,
    return
  }
  func.func @transform_0(%arg0: i32) -> (i32, i32) {
    %c0_i32 = arith.constant 0 : i32
    %c0_i32_0 = arith.constant 0 : i32
    return %arg0, %c0_i32 : i32, i32
  }
  func.func @transform_1(%arg0: i32) -> (i32, i32) {
    %c0_i32 = arith.constant 0 : i32
    %c0_i32_0 = arith.constant 0 : i32
    %c0_i32_1 = arith.constant 0 : i32
    return %c0_i32, %c0_i32_0 : i32, i32
  }
  func.func @transform_2(%arg0: i32) -> (i32, i32) {
    %c0_i32 = arith.constant 0 : i32
    %c0_i32_0 = arith.constant 0 : i32
    %c0_i32_1 = arith.constant 0 : i32
    return %c0_i32, %c0_i32_0 : i32, i32
  }
  func.func @transform_3(%arg0: i32) -> (i32, i32) {
    %c0_i32 = arith.constant 0 : i32
    %c0_i32_0 = arith.constant 0 : i32
    %c0_i32_1 = arith.constant 0 : i32
    return %c0_i32, %c0_i32_0 : i32, i32
  }
  func.func @transform_4(%arg0: i32) -> (i32, i32) {
    %c0_i32 = arith.constant 0 : i32
    %c0_i32_0 = arith.constant 0 : i32
    %c0_i32_1 = arith.constant 0 : i32
    return %c0_i32, %c0_i32_0 : i32, i32
  }
  func.func @transform_5(%arg0: i32) -> (i32, i32) {
    %c0_i32 = arith.constant 0 : i32
    %c0_i32_0 = arith.constant 0 : i32
    %c0_i32_1 = arith.constant 0 : i32
    return %c0_i32, %c0_i32_0 : i32, i32
  }
  func.func @transform_6(%arg0: i32) -> (i32, i32) {
    %c0_i32 = arith.constant 0 : i32
    %c0_i32_0 = arith.constant 0 : i32
    %c0_i32_1 = arith.constant 0 : i32
    return %c0_i32, %c0_i32_0 : i32, i32
  }
  func.func @transform_7(%arg0: i32) -> (i32, i32) {
    %c0_i32 = arith.constant 0 : i32
    %c0_i32_0 = arith.constant 0 : i32
    return %arg0, %c0_i32 : i32, i32
  }
}

</mosaic_0001>

<bundles_post_ra>
// kernel: tpu_custom_call.1
= control target key start
LH: loop header
LB: loop body
LE: loop exit
PB: predicated region body
PF: predicated region fallthrough
CT: control target
= control target key end

     0   :  { %12 = vsyncpa [#allocation3], 0  ;;  %s678_s0 = inlined_call_operand.hbm [shape: f32[8,16], index: 0, kind: input, shape index: {}]   ;;  %s679_s1 = inlined_call_operand.hbm [shape: f32[16,32], index: 1, kind: input, shape index: {}]   ;;  %s680_s2 = inlined_call_operand.vmem [shape: f32[1,32], index: 2, kind: input, shape index: {}]   ;;  %s681_s3 = inlined_call_operand.hbm [shape: f32[32,32], index: 3, kind: input, shape index: {}]   ;;  %s682_s4 = inlined_call_operand.vmem [shape: f32[1,32], index: 4, kind: input, shape index: {}]   ;;  %s683_s5 = inlined_call_operand.hbm [shape: f32[32,128], index: 5, kind: input, shape index: {}]   ;;  %s684_s6 = inlined_call_operand.vmem [shape: f32[1,128], index: 6, kind: input, shape index: {}]   ;;  %s685_s7 = inlined_call_operand.hbm [shape: f32[8,128], index: 7, kind: output, shape index: {}]  }
   0x1   :  { %13 = vsyncpa [#allocation6], 0 }
   0x2   :  { %14 = vsyncpa [#allocation9], 0 }
   0x3   :  { %15 = vsyncpa [#allocation4], 0  ;;  %s548_s24 = smov [#allocation5]   ;;  %s430_s28 = scalar_lea.hbm %s679_s1, 256 }
   0x4   :  { %s31_s25 = sshll.u32 %s548_s24, 4  ;;  %p431_p0 = scmp.ne.s32.totalorder %s679_s1, %s430_s28  ;;  %s32_s25 = int_to_ptr.vmem [resolvable:$true] %s31_s25 }
   0x5   :  { %p434_p1 = scmp.lt.u32.totalorder %s430_s28, %s679_s1 }
   0x7   :  { %p436_p2 = pnand %p434_p1, %p431_p0 }
   0x9   :  { %439 = shalt.err (!%p436_p2)
}
   0xa   :  { %s440_s10 = scalar_lea.vmem %s32_s25, 256  ;;  %p445_p4 = scmp.lt.s32.totalorder %s32_s25, %s32_s25 }
   0xb   :  { %p441_p3 = scmp.ne.s32.totalorder %s32_s25, %s440_s10  ;;  %p446_p5 = scmp.lt.s32.totalorder %s440_s10, %s440_s10 }
   0xd   :  { %p447_p6 = por %p446_p5, %p445_p4 }
   0xf   :  { %p448_p7 = pnand %p447_p6, %p441_p3 }
  0x11   :  { %451 = shalt.err (!%p448_p7)
}
  0x12   :  { %s549_s11 = smov 128   ;;  %s550_s12 = smov 8  }
  0x13   :  { %37 = dma.hbm_to_vmem [thread:$0]  %s679_s1, 256, %s32_s25, [#allocation6], %s549_s11, %s549_s11, %s550_s12  }
  0x14   :  { %s551_s15 = smov [#allocation2]   ;;  %s552_s17 = smov [#allocation7]  }
  0x15   :  { %s22_s16 = sshll.u32 %s551_s15, 4  ;;  %s45_s18 = sshll.u32 %s552_s17, 4  ;;  %s23_s16 = int_to_ptr.vmem [resolvable:$true] %s22_s16  ;;  %s46_s18 = int_to_ptr.vmem [resolvable:$true] %s45_s18 }
  0x16   :  { %s452_s21 = scalar_lea.hbm %s678_s0, 128 }
  0x17   :  { %p453_p8 = scmp.ne.s32.totalorder %s678_s0, %s452_s21  ;;  %p456_p9 = scmp.lt.u32.totalorder %s452_s21, %s678_s0 }
  0x19   :  { %p458_p10 = pnand %p456_p9, %p453_p8 }
  0x1b   :  { %461 = shalt.err (!%p458_p10)
}
  0x1c   :  { %s462_s1 = scalar_lea.vmem %s23_s16, 128  ;;  %p467_p12 = scmp.lt.s32.totalorder %s23_s16, %s23_s16 }
  0x1d   :  { %p463_p11 = scmp.ne.s32.totalorder %s23_s16, %s462_s1  ;;  %p468_p13 = scmp.lt.s32.totalorder %s462_s1, %s462_s1 }
  0x1f   :  { %p469_p0 = por %p468_p13, %p467_p12 }
  0x21   :  { %p470_p1 = pnand %p469_p0, %p463_p11 }
  0x23   :  { %473 = shalt.err (!%p470_p1)
}
  0x24   :  { %25 = dma.hbm_to_vmem [thread:$0]  %s678_s0, 128, %s23_s16, [#allocation3]  }
  0x25   :  { %s474_s30 = scalar_lea.hbm %s681_s3, 512 }
  0x26   :  { %p475_p2 = scmp.ne.s32.totalorder %s681_s3, %s474_s30  ;;  %p478_p3 = scmp.lt.u32.totalorder %s474_s30, %s681_s3 }
  0x28   :  { %p480_p4 = pnand %p478_p3, %p475_p2 }
  0x2a   :  { %483 = shalt.err (!%p480_p4)
}
  0x2b   :  { %s484_s14 = scalar_lea.vmem %s46_s18, 512  ;;  %p489_p6 = scmp.lt.s32.totalorder %s46_s18, %s46_s18 }
  0x2c   :  { %p485_p5 = scmp.ne.s32.totalorder %s46_s18, %s484_s14  ;;  %p490_p7 = scmp.lt.s32.totalorder %s484_s14, %s484_s14 }
  0x2e   :  { %p491_p8 = por %p490_p7, %p489_p6 }
  0x30   :  { %p492_p9 = pnand %p491_p8, %p485_p5 }
  0x32   :  { %495 = shalt.err (!%p492_p9)
}
  0x33   :  { %51 = dma.hbm_to_vmem [thread:$0]  %s681_s3, 512, %s46_s18, [#allocation6], %s549_s11, %s549_s11, %s550_s12  }
  0x34   :  { %s553_s16 = smov [#allocation8]   ;;  %s496_s21 = scalar_lea.hbm %s683_s5, 512 }
  0x35   :  { %s59_s17 = sshll.u32 %s553_s16, 4  ;;  %p497_p10 = scmp.ne.s32.totalorder %s683_s5, %s496_s21  ;;  %s60_s17 = int_to_ptr.vmem [resolvable:$true] %s59_s17 }
  0x36   :  { %p500_p11 = scmp.lt.u32.totalorder %s496_s21, %s683_s5 }
  0x38   :  { %p502_p12 = pnand %p500_p11, %p497_p10 }
  0x3a   :  { %505 = shalt.err (!%p502_p12)
}
  0x3b   :  { %s506_s1 = scalar_lea.vmem %s60_s17, 512  ;;  %p511_p0 = scmp.lt.s32.totalorder %s60_s17, %s60_s17 }
  0x3c   :  { %p507_p13 = scmp.ne.s32.totalorder %s60_s17, %s506_s1  ;;  %p512_p1 = scmp.lt.s32.totalorder %s506_s1, %s506_s1 }
  0x3e   :  { %p513_p2 = por %p512_p1, %p511_p0 }
  0x40   :  { %p514_p3 = pnand %p513_p2, %p507_p13 }
  0x42   :  { %517 = shalt.err (!%p514_p3)
}
  0x43   :  { %65 = dma.hbm_to_vmem [thread:$0]  %s683_s5, 512, %s60_s17, [#allocation9], %s549_s11, %s549_s11, %s550_s12  }
  0x44   :  { %540 = dma.done.wait [#allocation3], 128  }
  0x45   :  { %541 = vsyncadd [#allocation3], 4294967168 }
  0x46   :  { %542 = dma.done.wait [#allocation6], 768  }
  0x47   :  { %543 = vsyncadd [#allocation6], 4294966528 }
  0x48   :  { %544 = dma.done.wait [#allocation9], 512  }
  0x49   :  { %545 = vsyncadd [#allocation9], 4294966784  ;;  %v554_v0 = vmov 0.0|0.0   ;;  %vm555_vm0 = vmmov 0   ;;  %v556_v1 = vmov 0.0   ;;  %v81_v2 = vld [vmem:[#allocation5] sm:$0xff] }
  0x4a   :  { %401 = vmatprep.subr.bf16.mxu0 %v554_v0  ;;  %376 = vmatprep.mubr.msk.f32.mxu0 %vm555_vm0, %v556_v1  ;;  %v82_v3 = vld [vmem:[#allocation5 + $0x8] sm:$0xff]  ;;  %v80_v5 = vld [vmem:[#allocation2] sm:$0xff]  ;;  %vm90_vm1 = vcmask 130048   ;;  %v165_v6 = vld [vmem:[#allocation7] sm:$0xff]  ;;  %vm176_vm2 = vcmask 261120   ;;  %s557_s28 = smov [#allocation10]  }
  0x4b   :  { %404 = vmatprep.subr.bf16.mxu1 %v554_v0  ;;  %387 = vmatprep.mubr.msk.f32.mxu1 %vm555_vm0, %v556_v1  ;;  %v402_v4 = vpack.c.bf16 %v82_v3, %v81_v2  ;;  %v166_v7 = vld [vmem:[#allocation7 + $0x8] sm:$0xff]  ;;  %v167_v8 = vld [vmem:[#allocation7 + $0x10] sm:$0xff]  ;;  %v168_v10 = vld [vmem:[#allocation7 + $0x18] sm:$0xff]  ;;  %s342_s29 = sshll.u32 %s557_s28, 4  ;;  %s343_s29 = int_to_ptr.vmem [resolvable:$true] %s342_s29 }
  0x4c   :  { %v405_v9 = vpack.c.bf16 %v166_v7, %v165_v6  ;;  %v408_v11 = vpack.c.bf16 %v168_v10, %v167_v8  ;;  %v353_v12 = vld [vmem:[%s680_s2] ss:$0 sm:$0xff]  ;;  %v251_v17 = vld [vmem:[#allocation8] sm:$0xff]  ;;  %v253_v19 = vld [vmem:[#allocation8 + $0x10] sm:$0xff]  ;;  %s518_s30 = scalar_lea.vmem %s343_s29, 128  ;;  %p523_p5 = scmp.lt.s32.totalorder %s343_s29, %s343_s29 }
  0x4d   :  { %403 = vmatpush3.bf16.msra.mxu0 %v402_v4  ;;  %v252_v18 = vld [vmem:[#allocation8 + $0x8] sm:$0xff]  ;;  %v254_v21 = vld [vmem:[#allocation8 + $0x18] sm:$0xff]  ;;  %p519_p4 = scmp.ne.s32.totalorder %s343_s29, %s518_s30  ;;  %p524_p6 = scmp.lt.s32.totalorder %s518_s30, %s518_s30 }
  0x4e   :  { %410 = vmatprep.subr.bf16.mxu0 %v554_v0  ;;  %406 = vmatpush3.bf16.msra.mxu1 %v405_v9  ;;  %v411_v20 = vpack.c.bf16 %v252_v18, %v251_v17  ;;  %v414_v22 = vpack.c.bf16 %v254_v21, %v253_v19  ;;  %v355_v23 = vld [vmem:[%s682_s4] ss:$0 sm:$0xff] }
  0x4f   :  { %407 = vmatprep.subr.bf16.mxu1 %v554_v0  ;;  %v357_v28 = vld [vmem:[%s684_s6] ss:$0 sm:$0xff]  ;;  %p525_p7 = por %p524_p6, %p523_p5 }
  0x50   :  { %377 = vmatmul.mubr.msk.f32.vlgmr.msra.gmra.mrb[0].mxu0 %vm90_vm1, %v80_v5 }
  0x51   :  { %398 = vmatprep.mubr.msk.f32.mxu0 %vm555_vm0, %v556_v1  ;;  %412 = vmatpush3.bf16.msra.mxu0 %v411_v20  ;;  %p526_p8 = pnand %p525_p7, %p519_p4 }
  0x52   :  { %409 = vmatpush3.bf16.msra.mxu1 %v408_v11  ;;  %413 = vmatprep.subr.bf16.mxu0 %v554_v0 }
  0x55   :  { %415 = vmatpush3.bf16.msra.mxu0 %v414_v22 }
 0x123   :  { %v160_v13 = vpop.f32.mrb[0].mxu0 }
 0x124   :  { %v161_v14 = vadd.f32 %v353_v12, %v160_v13  ;;  %v378_v15 = vpop.f32.mrb[1].mxu0 }
 0x126   :  { %426 = vtanh.f32 %v161_v14 }
 0x130   :  { %v427_v16 = vpop.eup %426 }
 0x131   :  { %388 = vmatmul.mubr.msk.f32.vlgmr.msra.gmra.mrb[0].mxu1 %vm176_vm2, %v427_v16 }
 0x204   :  { %v246_v24 = vpop.f32.mrb[0].mxu1 }
 0x205   :  { %v247_v25 = vadd.f32 %v355_v23, %v246_v24  ;;  %v389_v26 = vpop.f32.mrb[1].mxu1 }
 0x207   :  { %428 = vtanh.f32 %v247_v25 }
 0x211   :  { %v429_v27 = vpop.eup %428 }
 0x212   :  { %399 = vmatmul.mubr.msk.f32.vlgmr.msra.gmra.mrb[2].mxu0 %vm176_vm2, %v429_v27 }
 0x2e5   :  { %v331_v29 = vpop.f32.mrb[2].mxu0 }
 0x2e6   :  { %v332_v30 = vadd.f32 %v357_v28, %v331_v29  ;;  %v400_v31 = vpop.f32.mrb[3].mxu0 }
 0x2e8   :  { %335 = vst [vmem:[#allocation10] sm:$0xff] %v332_v30 }
 0x2e9   :  { %529 = shalt.err (!%p526_p8)
}
 0x2ea   :  { %s530_s9 = scalar_lea.hbm %s685_s7, 128 }
 0x2eb   :  { %p531_p9 = scmp.ne.s32.totalorder %s685_s7, %s530_s9  ;;  %p534_p10 = scmp.lt.u32.totalorder %s530_s9, %s685_s7 }
 0x2ed   :  { %p536_p11 = pnand %p534_p10, %p531_p9 }
 0x2ef   :  { %539 = shalt.err (!%p536_p11)
}
 0x2f0   :  { %345 = dma.vmem_to_hbm [thread:$0]  %s343_s29, 128, %s685_s7, [#allocation4]  }
 0x2f1   :  { %546 = dma.done.wait [#allocation4], 128  }
 0x2f2   :  { %547 = vsyncadd [#allocation4], 4294967168 }
 0x2f3   :  { %349 = vsyncpa [#allocation3], 1 }
 0x2f4   :  { %350 = vsyncpa [#allocation6], 1 }
 0x2f5   :  { %351 = vsyncpa [#allocation9], 1 }
 0x2f6   :  { %352 = vsyncpa [#allocation4], 1 }

</bundles_post_ra>
